<compile_context>
chip_gen: v6e
topology: v6e:2x2x1
jax: 0.10.0
libtpu: 0.0.40
codegen_flags: <defaults>
</compile_context>

<pallas_src>
import functools

import jax
import jax.numpy as jnp
import numpy as np
from jax import lax
from jax.experimental import pallas as pl
from jax.experimental.pallas import tpu as pltpu


def _sublayer_kernel(prev_ref, curr_ref, gamma_ref, beta_ref, out_ref, *, eps, d):
    """One grid step == one (TILE_M, D) slab of rows.

    prev_ref, curr_ref: (TILE_M, D) residual input / sublayer output
    gamma_ref, beta_ref: (1, D)     LayerNorm affine params
    out_ref:            (TILE_M, D) LayerNorm(curr + prev)
    """
    # dropout(curr) is identity (p = 0); residual add in f32.
    x = curr_ref[...].astype(jnp.float32) + prev_ref[...].astype(jnp.float32)

    # Single-pass LayerNorm statistics over the last (lane) dim,
    # PyTorch semantics (biased variance), f32 accumulation.
    inv_d = jnp.float32(1.0 / d)
    s = jnp.sum(x, axis=-1, keepdims=True)
    sq = jnp.sum(x * x, axis=-1, keepdims=True)
    mean = s * inv_d
    var = jnp.maximum(sq * inv_d - mean * mean, 0.0)   # clamp tiny cancellation error
    inv = lax.rsqrt(var + eps)                         # EUP slot, ~free next to VPU work

    y = (x - mean) * inv * gamma_ref[...].astype(jnp.float32) \
        + beta_ref[...].astype(jnp.float32)
    out_ref[...] = y.astype(out_ref.dtype)


def _vmem_budget_bytes():
    """~65% of this generation's physical VMEM, capped at 96 MiB."""
    try:
        cap = int(pltpu.get_tpu_info().vmem_capacity_bytes)
    except Exception:
        cap = 64 << 20  # conservative (v7x-sized) fallback
    return min(int(cap * 0.65), 96 << 20)


def _pick_row_tile(n_rows, d, itemsize, vmem_budget):
    """Largest sublane-aligned row tile whose double-buffered working set fits VMEM."""
    # Sublane packing: 8 rows / f32 vreg, 16 for 2-byte dtypes, 32 for 1-byte.
    align = {4: 8, 2: 16, 1: 32}.get(itemsize, 8)
    if n_rows <= align:
        return n_rows  # single full-extent block; nothing to tile

    # Bytes streamed through VMEM per row:
    #   (prev + curr + out) x 2 pipeline buffers in input dtype
    #   + ~2 f32-width temps (x and the normalized product) managed by the compiler.
    bytes_per_row = (3 * 2 * itemsize + 2 * 4) * d
    max_rows = max(vmem_budget // bytes_per_row, align)

    # 512-1024 rows already saturate HBM bandwidth; no benefit beyond that.
    tile = min(int(max_rows), 1024, n_rows)
    tile = max((tile // align) * align, align)

    # Keep >= 2 grid steps so the "parallel" axis can shard across 2 TCs (v7x).
    if pl.cdiv(n_rows, tile) < 2:
        half = pl.cdiv(n_rows, 2)
        tile = max(((half + align - 1) // align) * align, align)
    return tile


def sublayer_connection(prev, curr, gamma, beta, *, eps=1e-5):
    """Pallas forward of SublayerConnection: LayerNorm(dropout(curr) + prev)."""
    assert prev.shape == curr.shape
    orig_shape = prev.shape
    D = orig_shape[-1]
    N = int(np.prod(orig_shape[:-1]))

    prev2 = prev.reshape(N, D)
    curr2 = curr.reshape(N, D)
    gamma2 = gamma.reshape(1, D)
    beta2 = beta.reshape(1, D)

    itemsize = jnp.dtype(prev.dtype).itemsize
    vmem_budget = _vmem_budget_bytes()
    tile_m = _pick_row_tile(N, D, itemsize, vmem_budget)
    grid = (pl.cdiv(N, tile_m),)

    kernel = functools.partial(_sublayer_kernel, eps=float(eps), d=D)

    row_spec = pl.BlockSpec((tile_m, D), lambda i: (i, 0))
    const_spec = pl.BlockSpec((1, D), lambda i: (0, 0))

    # Scoped-VMEM limit sized to the actual double-buffered working set
    # (+ small slack for gamma/beta and compiler temps).
    working_set = (3 * 2 * itemsize + 2 * 4) * D * tile_m + 2 * 4 * D
    vmem_limit = int(min(max(working_set + (4 << 20), 16 << 20), vmem_budget + (8 << 20)))

    cost = pl.CostEstimate(
        flops=8 * N * D,            # add, sub, 2 muls, fma-ish affine, 2 reduce passes
        transcendentals=N,          # one rsqrt per row
        bytes_accessed=3 * N * D * itemsize,
    )

    out2 = pl.pallas_call(
        kernel,
        grid=grid,
        in_specs=[row_spec, row_spec, const_spec, const_spec],
        out_specs=row_spec,
        out_shape=jax.ShapeDtypeStruct((N, D), prev.dtype),
        compiler_params=pltpu.CompilerParams(
            dimension_semantics=("parallel",),
            vmem_limit_bytes=vmem_limit),
        cost_estimate=cost,
    )(prev2, curr2, gamma2, beta2)

    return out2.reshape(orig_shape)


def _reference(prev, curr, gamma, beta, *, eps=1e-5):
    """Pure-JAX reference mirroring the PyTorch module (eval mode)."""
    x = (curr + prev).astype(jnp.float32)
    mean = jnp.mean(x, axis=-1, keepdims=True)
    var = jnp.mean(jnp.square(x - mean), axis=-1, keepdims=True)
    y = (x - mean) / jnp.sqrt(var + eps) * gamma + beta
    return y.astype(prev.dtype)


if __name__ == "__main__":
    B, T, D = 2, 8, 32

    key = jax.random.PRNGKey(0)
    k_prev, k_curr, k_g, k_b = jax.random.split(key, 4)
    prev = jax.random.normal(k_prev, (B, T, D), dtype=jnp.float32)
    curr = jax.random.normal(k_curr, (B, T, D), dtype=jnp.float32)
    # LayerNorm params (PyTorch init: gamma=1, beta=0; perturb to make the test real).
    gamma = 1.0 + 0.1 * jax.random.normal(k_g, (D,), dtype=jnp.float32)
    beta = 0.1 * jax.random.normal(k_b, (D,), dtype=jnp.float32)

    y = sublayer_connection(prev, curr, gamma, beta)
    y = jax.block_until_ready(y)

    y_ref = _reference(prev, curr, gamma, beta)
    np.testing.assert_allclose(np.asarray(y), np.asarray(y_ref), rtol=1e-5, atol=1e-5)

    print("KERNEL_OK")
</pallas_src>

<mosaic_0001>
module attributes {stable_mosaic.version = 11 : i64} {
  func.func @_sublayer_kernel(%arg0: i32, %arg1: memref<8x32xf32, #tpu.memory_space<vmem>>, %arg2: memref<8x32xf32, #tpu.memory_space<vmem>>, %arg3: memref<1x32xf32, #tpu.memory_space<vmem>>, %arg4: memref<1x32xf32, #tpu.memory_space<vmem>>, %arg5: memref<8x32xf32, #tpu.memory_space<vmem>>) attributes {dimension_semantics = [#tpu.dimension_semantics<parallel>], iteration_bounds = array<i64: 2>, scalar_prefetch = 0 : i64, scratch_operands = 0 : i64, tpu.core_type = #tpu.core_type<tc>, window_params = [{transform_indices = @transform_0, window_bounds = array<i64: 8, 32>}, {transform_indices = @transform_1, window_bounds = array<i64: 8, 32>}, {pipeline_mode = #tpu.pipeline_mode<synchronous>, transform_indices = @transform_2, window_bounds = array<i64: 1, 32>}, {pipeline_mode = #tpu.pipeline_mode<synchronous>, transform_indices = @transform_3, window_bounds = array<i64: 1, 32>}, {transform_indices = @transform_4, window_bounds = array<i64: 8, 32>}]} {
    %c0 = arith.constant 0 : index
    %c0_0 = arith.constant 0 : index
    %0 = vector.load %arg2[%c0, %c0_0] : memref<8x32xf32, #tpu.memory_space<vmem>>, vector<8x32xf32>
    %c0_1 = arith.constant 0 : index
    %c0_2 = arith.constant 0 : index
    %1 = vector.load %arg1[%c0_1, %c0_2] : memref<8x32xf32, #tpu.memory_space<vmem>>, vector<8x32xf32>
    %2 = arith.addf %0, %1 : vector<8x32xf32>
    %cst = arith.constant dense<0.000000e+00> : vector<8xf32>
    %3 = vector.multi_reduction <add>, %2, %cst [1] : vector<8x32xf32> to vector<8xf32>
    %4 = vector.shape_cast %3 : vector<8xf32> to vector<8x1xf32>
    %5 = arith.mulf %2, %2 : vector<8x32xf32>
    %cst_3 = arith.constant dense<0.000000e+00> : vector<8xf32>
    %6 = vector.multi_reduction <add>, %5, %cst_3 [1] : vector<8x32xf32> to vector<8xf32>
    %7 = vector.shape_cast %6 : vector<8xf32> to vector<8x1xf32>
    %cst_4 = arith.constant 3.125000e-02 : f32
    %8 = vector.broadcast %cst_4 : f32 to vector<8x1xf32>
    %9 = arith.mulf %4, %8 : vector<8x1xf32>
    %cst_5 = arith.constant 3.125000e-02 : f32
    %10 = vector.broadcast %cst_5 : f32 to vector<8x1xf32>
    %11 = arith.mulf %7, %10 : vector<8x1xf32>
    %12 = arith.mulf %9, %9 : vector<8x1xf32>
    %13 = arith.subf %11, %12 : vector<8x1xf32>
    %cst_6 = arith.constant 0.000000e+00 : f32
    %14 = vector.broadcast %cst_6 : f32 to vector<8x1xf32>
    %15 = arith.maximumf %13, %14 : vector<8x1xf32>
    %cst_7 = arith.constant 9.99999974E-6 : f32
    %16 = vector.broadcast %cst_7 : f32 to vector<8x1xf32>
    %17 = arith.addf %15, %16 : vector<8x1xf32>
    %18 = math.rsqrt %17 : vector<8x1xf32>
    %19 = vector.broadcast %9 : vector<8x1xf32> to vector<8x32xf32>
    %20 = arith.subf %2, %19 : vector<8x32xf32>
    %21 = vector.broadcast %18 : vector<8x1xf32> to vector<8x32xf32>
    %22 = arith.mulf %20, %21 : vector<8x32xf32>
    %c0_8 = arith.constant 0 : index
    %c0_9 = arith.constant 0 : index
    %23 = vector.load %arg3[%c0_8, %c0_9] : memref<1x32xf32, #tpu.memory_space<vmem>>, vector<1x32xf32>
    %24 = vector.broadcast %23 : vector<1x32xf32> to vector<8x32xf32>
    %25 = arith.mulf %22, %24 : vector<8x32xf32>
    %c0_10 = arith.constant 0 : index
    %c0_11 = arith.constant 0 : index
    %26 = vector.load %arg4[%c0_10, %c0_11] : memref<1x32xf32, #tpu.memory_space<vmem>>, vector<1x32xf32>
    %27 = vector.broadcast %26 : vector<1x32xf32> to vector<8x32xf32>
    %28 = arith.addf %25, %27 : vector<8x32xf32>
    %c0_12 = arith.constant 0 : index
    %c0_13 = arith.constant 0 : index
    %29 = vector.load %arg5[%c0_12, %c0_13] : memref<8x32xf32, #tpu.memory_space<vmem>>, vector<8x32xf32>
    tpu.vector_store %arg5[%c0_12, %c0_13], %28 {strides = array<i32>} : memref<8x32xf32, #tpu.memory_space<vmem>>, vector<8x32xf32>,
    return
  }
  func.func @transform_0(%arg0: i32) -> (i32, i32) {
    %c0_i32 = arith.constant 0 : i32
    %c0_i32_0 = arith.constant 0 : i32
    return %arg0, %c0_i32 : i32, i32
  }
  func.func @transform_1(%arg0: i32) -> (i32, i32) {
    %c0_i32 = arith.constant 0 : i32
    %c0_i32_0 = arith.constant 0 : i32
    return %arg0, %c0_i32 : i32, i32
  }
  func.func @transform_2(%arg0: i32) -> (i32, i32) {
    %c0_i32 = arith.constant 0 : i32
    %c0_i32_0 = arith.constant 0 : i32
    %c0_i32_1 = arith.constant 0 : i32
    return %c0_i32, %c0_i32_0 : i32, i32
  }
  func.func @transform_3(%arg0: i32) -> (i32, i32) {
    %c0_i32 = arith.constant 0 : i32
    %c0_i32_0 = arith.constant 0 : i32
    %c0_i32_1 = arith.constant 0 : i32
    return %c0_i32, %c0_i32_0 : i32, i32
  }
  func.func @transform_4(%arg0: i32) -> (i32, i32) {
    %c0_i32 = arith.constant 0 : i32
    %c0_i32_0 = arith.constant 0 : i32
    return %arg0, %c0_i32 : i32, i32
  }
}

</mosaic_0001>

<bundles_post_ra>
// kernel: tpu_custom_call.1
= control target key start
LH: loop header
LB: loop body
LE: loop exit
PB: predicated region body
PF: predicated region fallthrough
CT: control target
= control target key end

     0   :  { %9 = vsyncpa [#allocation3], 0  ;;  %s826_s0 = inlined_call_operand.hbm [shape: f32[16,32], index: 0, kind: input, shape index: {}]   ;;  %s827_s1 = inlined_call_operand.hbm [shape: f32[16,32], index: 1, kind: input, shape index: {}]   ;;  %s828_s2 = inlined_call_operand.vmem [shape: f32[1,32], index: 2, kind: input, shape index: {}]   ;;  %s829_s3 = inlined_call_operand.vmem [shape: f32[1,32], index: 3, kind: input, shape index: {}]   ;;  %s830_s4 = inlined_call_operand.hbm [shape: f32[16,32], index: 4, kind: output, shape index: {}]  }
   0x1   :  { %11 = vsyncpa [#allocation3 + $0x1], 0 }
   0x2   :  { %12 = vsyncpa [#allocation6], 0 }
   0x3   :  { %14 = vsyncpa [#allocation6 + $0x1], 0 }
   0x4   :  { %15 = vsyncpa [#allocation4], 0 }
   0x5   :  { %17 = vsyncpa [#allocation4 + $0x1], 0  ;;  %s618_s15 = smov 0   ;;  %s620_s16 = smov 0  }
   0x6   :  { %s622_s17 = smov 0   ;;  %s624_s18 = smov 0  }
   0x7 LB: > { %s639_s19 = sadd.s32 4294967295, %s588_s18   ;;  %s394_s20 = sadd.s32 4294967294, %s588_s18   ;;  %s588_s18 = sphi %s624_s18, %s849_s18   ;;  %s584_s17 = sphi %s622_s17, %s848_s17   ;;  %s580_s16 = sphi %s620_s16, %s847_s16   ;;  %s576_s15 = sphi %s618_s15, %s846_s15  }
   0x8   : > { %s643_s21 = sadd.s32 1, %s588_s18   ;;  %s30_s22 = sadd.s32 1, %s584_s17 }
   0x9   : > { %s27_s23 = ssub.s32 %s588_s18, %s643_s21  ;;  %p37_p0 = scmp.ne.s32.totalorder %s584_s17, %s580_s16 }
   0xa   : > { %p28_p1 = scmp.eq.s32.totalorder %s27_s23, 0  ;;  %p38_p2 = scmp.eq.s32.totalorder %s588_s18, 0 }
   0xb   : > { %p43_p3 = scmp.ne.s32.totalorder %s580_s16, %s576_s15  ;;  %p44_p4 = scmp.eq.s32.totalorder %s639_s19, 0 }
   0xc   : > { %s655_s24 = scalar_select %p28_p1, %s584_s17, %s30_s22  }
   0xd   : > { %p657_p5 = por %p38_p2, %p37_p0  ;;  %p661_p6 = por %p44_p4, %p43_p3 }
   0xe   : > { %p135_p7 = scmp.eq.s32.totalorder %s639_s19, 1  ;;  %p141_p8 = scmp.eq.s32.totalorder %s394_s20, 1 }
   0xf   : > { %s834_s26 = scalar_select %p661_p6, 1, 0 }
  0x10   : > { %p428_p10 = scmp.lt.s32.totalorder %s588_s18, 2  ;;  %p668_p11 = por %p135_p7, %p37_p0 }
  0x11   : > { %p672_p12 = por %p141_p8, %p43_p3  ;;  %s677_s29 = sand.u32 1, %s584_s17  }
  0x12   : > { %s835_s27 = scalar_select %p668_p11, 1, 0 }
  0x13   : > { %s836_s28 = scalar_select %p672_p12, 1, 0 }
  0x14   : > { %s398_s30 = sshll.u32 %s588_s18, 7  ;;  %s397_s5 = sshll.u32 %s677_s29, 3 }
  0x15   : > { %s686_s8 = scalar_lea.hbm %s826_s0, %s398_s30  ;;  %s171_s9 = scalar_lea.vmem [#allocation2], %s397_s5 }
  0x16   : > { %s178_s10 = sshll.u32 %s171_s9, 4  ;;  %p692_p13 = pnand %p428_p10, %p657_p5  ;;  %s696_s10 = int_to_ptr.vmem [resolvable:$true] %s178_s10 }
  0x17   : > { %s168_s12 = scalar_lea.sflag [#allocation3], %s677_s29  ;;  %s464_s13 = scalar_lea.hbm %s686_s8, 128 }
  0x18   : > { %p465_p2 = scmp.ne.s32.totalorder %s686_s8, %s464_s13  ;;  %p466_p3 = pneg %p692_p13 }
  0x19   : > { %s469_s22 = scalar_lea.hbm %s826_s0, 256  ;;  %p470_p5 = scmp.lt.s32.totalorder %s686_s8, %s826_s0 }
  0x1a   : > { %p467_p4 = pnand %p466_p3, %p465_p2  ;;  %p471_p8 = scmp.lt.s32.totalorder %s469_s22, %s464_s13 }
  0x1c   : > { %p468_p7 = pneg %p467_p4  ;;  %p472_p10 = por %p471_p8, %p470_p5 }
  0x1e   : > { %p473_p9 = pnand %p472_p10, %p468_p7 }
  0x20   : > { %476 = shalt.err (!%p473_p9)
}
  0x21   : > { %s477_s6 = scalar_lea.vmem %s696_s10, 128  ;;  %s590_s7 = smov [#allocation2]  }
  0x22   : > { %p478_p0 = scmp.ne.s32.totalorder %s696_s10, %s477_s6  ;;  %s482_s9 = sshll.u32 %s590_s7, 4  ;;  %s483_s9 = int_to_ptr.vmem [resolvable:$false] %s482_s9 }
  0x23   : > { %s484_s14 = scalar_lea.vmem %s483_s9, 256  ;;  %p485_p1 = scmp.lt.s32.totalorder %s696_s10, %s483_s9 }
  0x24   : > { %p480_p2 = pnand %p478_p0, %p466_p3  ;;  %p486_p12 = scmp.lt.s32.totalorder %s484_s14, %s477_s6 }
  0x26   : > { %p481_p4 = pneg %p480_p2  ;;  %p487_p11 = por %p486_p12, %p485_p1 }
  0x28   : > { %p488_p5 = pnand %p487_p11, %p481_p4 }
  0x2a   : > { %491 = shalt.err (!%p488_p5)
}
  0x2b   : > { %420 = dma.hbm_to_vmem [thread:$0]  (!%p692_p13), %s686_s8, 128, %s696_s10, %s168_s12  }
  0x2c   : > { %p838_p9 = scmp.lt.s32.totalorder %s588_s18, 3  ;;  %p839_p0 = scmp.ge.s32.totalorder %s588_s18, 1 }
  0x2d   : > { %s738_s23 = scalar_lea.hbm %s827_s1, %s398_s30  ;;  %s189_s25 = scalar_lea.vmem [#allocation5], %s397_s5 }
  0x2e   : > { %p729_p7 = pnand %p839_p0, %p838_p9  ;;  %s196_s6 = sshll.u32 %s189_s25, 4  ;;  %s197_s6 = int_to_ptr.vmem [resolvable:$true] %s196_s6 }
  0x2f   : > { %s186_s8 = scalar_lea.sflag [#allocation6], %s677_s29  ;;  %s492_s10 = scalar_lea.hbm %s738_s23, 128 }
  0x30   : > { %s840_s13 = scalar_select %p729_p7, 1, 0 }
  0x31   : > { %p493_p11 = scmp.ne.s32.totalorder %s738_s23, %s492_s10  ;;  %s497_s9 = scalar_lea.hbm %s827_s1, 256 }
  0x32   : > { %p498_p8 = scmp.lt.s32.totalorder %s738_s23, %s827_s1  ;;  %p499_p10 = scmp.lt.s32.totalorder %s497_s9, %s492_s10 }
  0x33   : > { %p495_p12 = pnand %p493_p11, %p466_p3 }
  0x34   : > { %p500_p2 = por %p499_p10, %p498_p8 }
  0x35   : > { %p496_p1 = pneg %p495_p12 }
  0x37   : > { %p501_p4 = pnand %p500_p2, %p496_p1 }
  0x39   : > { %504 = shalt.err (!%p501_p4)
}
  0x3a   : > { %s505_s5 = scalar_lea.vmem %s197_s6, 128  ;;  %s591_s29 = smov [#allocation5]  }
  0x3b   : > { %p506_p5 = scmp.ne.s32.totalorder %s197_s6, %s505_s5  ;;  %s510_s20 = sshll.u32 %s591_s29, 4  ;;  %s511_s20 = int_to_ptr.vmem [resolvable:$false] %s510_s20 }
  0x3c   : > { %s512_s22 = scalar_lea.vmem %s511_s20, 256  ;;  %p513_p11 = scmp.lt.s32.totalorder %s197_s6, %s511_s20 }
  0x3d   : > { %p508_p9 = pnand %p506_p5, %p466_p3  ;;  %p514_p12 = scmp.lt.s32.totalorder %s512_s22, %s505_s5 }
  0x3f   : > { %p509_p0 = pneg %p508_p9  ;;  %p515_p6 = por %p514_p12, %p513_p11 }
  0x41   : > { %p516_p7 = pnand %p515_p6, %p509_p0 }
  0x43   : > { %519 = shalt.err (!%p516_p7)
}
  0x44   : > { %423 = dma.hbm_to_vmem [thread:$0]  (!%p692_p13), %s738_s23, 128, %s197_s6, %s186_s8  }
  0x45   : > { %p841_p1 = scmp.ne.s32.totalorder %s840_s13, 0 }
  0x46   : > { %s764_s25 = sand.u32 (!%p841_p1), 1, %s580_s16   ;;  %p842_p6 = scmp.ne.s32.totalorder (!%p841_p1), %s834_s26, 0 }
  0x47   : > { %205 = sbr.rel (%p841_p1) target bundleno = 266 (0x10a), region = 36  ;;  %s767_s10 = sshll.u32 (!%p841_p1), %s764_s25, 3 }
  0x48   : > { %s208_s12 = scalar_lea.sflag (!%p841_p1), [#allocation3], %s764_s25  ;;  %s211_s7 = scalar_lea.vmem (!%p841_p1), [#allocation2], %s767_s10 }
  0x4c   : > { %563 = dma.done.wait (%p842_p6), %s208_s12, 128  }
  0x4d   : > { %565 = vsyncadd (%p842_p6), %s208_s12, 4294967168  ;;  %s217_s11 = scalar_lea.sflag [#allocation6], %s764_s25  ;;  %s220_s13 = scalar_lea.vmem [#allocation5], %s767_s10 }
  0x4e   : > { %567 = dma.done.wait (%p842_p6), %s217_s11, 128  }
  0x4f   : > { %569 = vsyncadd (%p842_p6), %s217_s11, 4294967168  ;;  %v250_v0 = vld [vmem:[%s220_s13] sm:$0xff]  ;;  %v251_v1 = vld [vmem:[%s211_s7] sm:$0xff]  ;;  %vm253_vm0 = vcmask 261120   ;;  %s408_s9 = sshll.u32 %s639_s19, 7  ;;  %s249_s30 = scalar_lea.vmem [#allocation7], %s767_s10 }
  0x50   : > { %v252_v2 = vadd.f32 %v251_v1, %v250_v0  ;;  %v405_v16 = vld [vmem:[%s828_s2] ss:$0 sm:$0xff]  ;;  %s301_s14 = sshll.u32 %s249_s30, 4  ;;  %s299_s20 = scalar_lea.hbm %s830_s4, %s408_s9  ;;  %s302_s14 = int_to_ptr.vmem [resolvable:$true] %s301_s14 }
  0x51   : > { %v406_v18 = vld [vmem:[%s829_s3] ss:$0 sm:$0xff]  ;;  %s288_s22 = scalar_lea.sflag [#allocation4], %s764_s25  ;;  %s520_s12 = scalar_lea.vmem %s302_s14, 128 }
  0x52   : > { %v254_v3 = vsel %vm253_vm0, %v252_v2, 0.0  ;;  %v257_v4 = vmul.f32 %v252_v2, %v252_v2  ;;  %p521_p13 = scmp.ne.s32.totalorder %s302_s14, %s520_s12  ;;  %p843_p3 = scmp.ne.s32.totalorder %s835_s27, 0 }
  0x53   : > { %255 = vadd.xlane.f32.xlu0 %v254_v3  ;;  %s592_s7 = smov [#allocation7]  }
  0x54   : > { %v258_v5 = vsel %vm253_vm0, %v257_v4, 0.0  ;;  %p522_p7 = pnand %p521_p13, %p843_p3  ;;  %s524_s11 = sshll.u32 %s592_s7, 4  ;;  %s525_s11 = int_to_ptr.vmem [resolvable:$false] %s524_s11 }
  0x55   : > { %s526_s19 = scalar_lea.vmem %s525_s11, 256  ;;  %p527_p10 = scmp.lt.s32.totalorder %s302_s14, %s525_s11 }
  0x56   : > { %p523_p8 = pneg %p522_p7  ;;  %p528_p2 = scmp.lt.s32.totalorder %s526_s19, %s520_s12 }
  0x57   : > { %259 = vadd.xlane.f32.xlu0 %v258_v5 }
  0x58   : > { %p529_p4 = por %p528_p2, %p527_p10 }
  0x5a   : > { %p530_p5 = pnand %p529_p4, %p523_p8 }
  0xdc   : > { %v256_v6 = vpop.xlane.xlu0 %255 }
  0xdd   : > { %v261_v7 = vmul.f32 0.03125, %v256_v6 }
  0xdf   : > { %v263_v9 = vmul.f32 %v261_v7, %v261_v7  ;;  %v268_v14 = vsub.f32 %v252_v2, %v261_v7 }
  0xe0   : > { %v260_v8 = vpop.xlane.xlu0 %259 }
  0xe1   : > { %v262_v10 = vmul.f32 0.03125, %v260_v8 }
  0xe3   : > { %v264_v11 = vsub.f32 %v262_v10, %v263_v9 }
  0xe5   : > { %v265_v12 = vmax.f32 %v264_v11, 0.0 }
  0xe7   : > { %v266_v13 = vadd.f32 1e-05, %v265_v12 }
  0xe9   : > { %462 = vrsqrt.f32 %v266_v13 }
  0xf6   : > { %v463_v15 = vpop.eup %462 }
  0xf7   : > { %v269_v17 = vmul.f32 %v463_v15, %v268_v14 }
  0xf9   : > { %v277_v19 = vmul.f32 %v405_v16, %v269_v17 }
  0xfb   : > { %v285_v20 = vadd.f32 %v406_v18, %v277_v19 }
  0xfd   : > { %286 = vst.msk [vmem:[%s249_s30] sm:$0xff] %vm253_vm0, %v285_v20 }
  0xfe   : > { %533 = shalt.err (!%p530_p5)
}
  0xff   : > { %s534_s10 = scalar_lea.hbm %s299_s20, 128  ;;  %s538_s26 = scalar_lea.hbm %s830_s4, 256 }
 0x100   : > { %p535_p9 = scmp.ne.s32.totalorder %s299_s20, %s534_s10  ;;  %p539_p12 = scmp.lt.s32.totalorder %s299_s20, %s830_s4 }
 0x101   : > { %p540_p1 = scmp.lt.s32.totalorder %s538_s26, %s534_s10 }
 0x102   : > { %p536_p0 = pnand %p535_p9, %p843_p3 }
 0x103   : > { %p541_p6 = por %p540_p1, %p539_p12 }
 0x104   : > { %p537_p11 = pneg %p536_p0 }
 0x106   : > { %p542_p13 = pnand %p541_p6, %p537_p11 }
 0x108   : > { %545 = shalt.err (!%p542_p13)
}
 0x109   : > { %415 = dma.vmem_to_hbm [thread:$0]  (%p843_p3), %s302_s14, 128, %s299_s20, %s288_s22  }
 0x10a PF: > { %s313_s8 = sand.u32 1, %s576_s15   ;;  %p844_p7 = scmp.ne.s32.totalorder %s836_s28, 0 }
 0x10b   : > { %p845_p8 = scmp.ge.s32.totalorder %s588_s18, 2  ;;  %s314_s9 = scalar_lea.sflag [#allocation4], %s313_s8 }
 0x10d   : > { %p425_p10 = pnand %p845_p8, %p844_p7 }
 0x10f   : > { %p426_p2 = pneg %p425_p10 }
 0x111   : > { %571 = dma.done.wait (%p426_p2), %s314_s9, 128  }
 0x112   : > { %573 = vsyncadd (%p426_p2), %s314_s9, 4294967168  ;;  %p20_p4 = scmp.ge.s32.totalorder %s643_s21, 4   ;;  %s846_s15 = smov %s580_s16 }
 0x113   : > { %s847_s16 = smov %s584_s17  ;;  %s848_s17 = smov %s655_s24 }
 0x114   : > { %s849_s18 = smov %s643_s21  ;;  %22 = sbr.rel (!%p20_p4) target bundleno = 7 (0x7), region = 94 }
 0x119   :  { %319 = vsyncpa [#allocation3], 1 }
 0x11a   :  { %321 = vsyncpa [#allocation3 + $0x1], 1 }
 0x11b   :  { %322 = vsyncpa [#allocation6], 1 }
 0x11c   :  { %324 = vsyncpa [#allocation6 + $0x1], 1 }
 0x11d   :  { %325 = vsyncpa [#allocation4], 1 }
 0x11e   :  { %327 = vsyncpa [#allocation4 + $0x1], 1 }

</bundles_post_ra>
